<compile_context>
chip_gen: v6e
topology: v6e:2x2x1
jax: 0.10.0
libtpu: 0.0.40
codegen_flags: <defaults>
</compile_context>

<pallas_src>
import functools
import math

import jax
import jax.numpy as jnp
from jax.experimental import pallas as pl
from jax.experimental.pallas import tpu as pltpu

EPS = 1e-5
LANES = 128


def _ln_packed_kernel(x_ref, w_ref, s_ref, st_ref, o_ref, *, group):
    """Lane-dense tile: each packed row holds `pack` original rows of `group` channels.

    s_ref  : (cols, 128) f32 0/1 indicator, column g selects group g's lanes
             (columns >= pack are zero so every matmul operand is (8,128)-aligned).
    st_ref : (128, cols) = s^T, used to broadcast per-group stats back to lanes.
    """
    x = x_ref[...].astype(jnp.float32)                                       # (blk, cols), loaded once
    # Segmented reductions on the MXU (idle otherwise) -> full-lane VALU stays dense.
    sums = jnp.dot(x, s_ref[...], preferred_element_type=jnp.float32)        # (blk, 128)
    sumsq = jnp.dot(x * x, s_ref[...], preferred_element_type=jnp.float32)   # (blk, 128)
    inv_n = jnp.float32(1.0 / group)
    mean = sums * inv_n
    var = sumsq * inv_n - mean * mean            # biased variance (unbiased=False)
    inv = jax.lax.rsqrt(var + EPS)               # (blk, 128); padded cols give finite junk
    # Broadcast each group's inv back to its lanes (zero rows of s^T kill padded cols),
    # then a single full-width multiply and ONE unmasked lane-dense store.
    inv_full = jnp.dot(inv, st_ref[...], preferred_element_type=jnp.float32)  # (blk, cols)
    w = w_ref[...].astype(jnp.float32)                                        # (1, cols)
    # x (not x - mean) is scaled -> BiasFree semantics.
    o_ref[...] = (x * inv_full * w).astype(o_ref.dtype)


def _ln_plain_kernel(x_ref, w_ref, o_ref):
    """C is already lane-dense (>=128 multiple) or not worth packing."""
    x = x_ref[...].astype(jnp.float32)
    mean = jnp.mean(x, axis=-1, keepdims=True)
    d = x - mean
    var = jnp.mean(d * d, axis=-1, keepdims=True)      # biased variance
    inv = jax.lax.rsqrt(var + EPS)
    w = w_ref[...].astype(jnp.float32)
    o_ref[...] = (x * inv * w).astype(o_ref.dtype)     # x, not x - mean


def biasfree_layernorm(x, weight, *, block_bytes=4 << 20, max_packed_cols=1024):
    """x: (B, N, C) channel-last; weight: (C,). Returns same shape/dtype as x."""
    B, N, C = x.shape
    rows = B * N
    out_dtype = x.dtype
    itemsize = jnp.dtype(x.dtype).itemsize
    min_sub = max(8, 32 // itemsize)        # sublane granularity: 8 f32 / 16 bf16 / 32 int8

    x2d = x.reshape(rows, C)
    pack = LANES // math.gcd(C, LANES)      # smallest p with p*C a multiple of 128

    compiler_params = pltpu.CompilerParams(
        # TODO(synk): on v7x, verify this single "parallel" row axis is actually
        # sharded across both TensorCores (else switch to CORE_PARALLEL/core_map).
        dimension_semantics=("parallel",),
        vmem_limit_bytes=48 * 1024 * 1024,
    )

    if pack > 1 and pack * C <= max_packed_cols:
        # ---- lane-dense path: (rows, C) -> (rows/pack, pack*C); repack is free
        # (data is contiguous).  Pad a handful of rows if rows % pack != 0.
        cols = pack * C
        rows_p = -(-rows // pack) * pack
        if rows_p != rows:
            x2d = jnp.pad(x2d, ((0, rows_p - rows), (0, 0)))
        n_rows = rows_p // pack
        x_in = x2d.reshape(n_rows, cols)
        w_in = jnp.tile(weight, pack).reshape(1, cols)

        # Static block-diagonal 0/1 indicator, padded to 128 group-columns.
        seg = jnp.repeat(jnp.arange(pack, dtype=jnp.int32), C)                       # (cols,)
        s_mat = (seg[:, None] == jnp.arange(LANES, dtype=jnp.int32)[None, :]
                 ).astype(jnp.float32)                                               # (cols, 128)
        st_mat = s_mat.T                                                             # (128, cols)

        blk = max(min_sub, (block_bytes // (cols * 4)) // min_sub * min_sub)
        blk = min(blk, -(-n_rows // min_sub) * min_sub)
        grid = (pl.cdiv(n_rows, blk),)

        out = pl.pallas_call(
            functools.partial(_ln_packed_kernel, group=C),
            out_shape=jax.ShapeDtypeStruct((n_rows, cols), out_dtype),
            grid_spec=pltpu.PrefetchScalarGridSpec(
                num_scalar_prefetch=0,
                grid=grid,
                in_specs=[
                    pl.BlockSpec((blk, cols), lambda i: (i, 0)),     # x tile
                    pl.BlockSpec((1, cols), lambda i: (0, 0)),       # weight (fetched once)
                    pl.BlockSpec((cols, LANES), lambda i: (0, 0)),   # indicator S
                    pl.BlockSpec((LANES, cols), lambda i: (0, 0)),   # indicator S^T
                ],
                out_specs=pl.BlockSpec((blk, cols), lambda i: (i, 0)),
            ),
            compiler_params=compiler_params,
        )(x_in, w_in, s_mat, st_mat)

        out2d = out.reshape(rows_p, C)
        if rows_p != rows:
            out2d = out2d[:rows]
        return out2d.reshape(B, N, C)

    # ---- plain path: C already lane-dense (multiple of 128) or packing too wide.
    n_rows, cols = rows, C
    blk = max(min_sub, (block_bytes // (max(cols, LANES) * 4)) // min_sub * min_sub)
    blk = min(blk, -(-n_rows // min_sub) * min_sub)
    grid = (pl.cdiv(n_rows, blk),)

    out = pl.pallas_call(
        _ln_plain_kernel,
        out_shape=jax.ShapeDtypeStruct((n_rows, cols), out_dtype),
        grid_spec=pltpu.PrefetchScalarGridSpec(
            num_scalar_prefetch=0,
            grid=grid,
            in_specs=[
                pl.BlockSpec((blk, cols), lambda i: (i, 0)),
                pl.BlockSpec((1, cols), lambda i: (0, 0)),
            ],
            out_specs=pl.BlockSpec((blk, cols), lambda i: (i, 0)),
        ),
        compiler_params=compiler_params,
    )(x2d, weight.reshape(1, cols))
    return out.reshape(B, N, C)


def reference_biasfree_layernorm(x, weight):
    xf = x.astype(jnp.float32)
    var = jnp.var(xf, axis=-1, keepdims=True)            # ddof=0 (unbiased=False)
    return xf / jnp.sqrt(var + EPS) * weight.astype(jnp.float32)


if __name__ == "__main__":
    key = jax.random.PRNGKey(0)
    k1, k2, k3, k4, k5, kw = jax.random.split(key, 6)

    # ssdnet-style usage: NCHW (2, 32, 8, 8) -> to_3d -> (2, 64, 32), channel last.
    B, C, H, W = 2, 32, 8, 8
    x_nchw = jax.random.normal(k1, (B, C, H, W), dtype=jnp.float32)
    x = jnp.transpose(x_nchw, (0, 2, 3, 1)).reshape(B, H * W, C)
    w = jnp.ones((C,), jnp.float32)                      # module init: torch.ones
    out = jax.block_until_ready(biasfree_layernorm(x, w))
    assert out.shape == x.shape and out.dtype == x.dtype
    assert jnp.allclose(out, reference_biasfree_layernorm(x, w), atol=2e-5, rtol=2e-5), \
        "packed path mismatch vs reference"

    # C = 96: generalized packing (4 rows -> 384 lanes) with a non-unit weight.
    x2 = jax.random.normal(k2, (1, 40, 96), dtype=jnp.float32)
    w2 = 1.0 + 0.1 * jax.random.normal(kw, (96,), dtype=jnp.float32)
    out2 = jax.block_until_ready(biasfree_layernorm(x2, w2))
    assert jnp.allclose(out2, reference_biasfree_layernorm(x2, w2), atol=2e-5, rtol=2e-5), \
        "C=96 packed path mismatch vs reference"

    # rows not divisible by pack: exercises the zero-pad (no lane-padded fallback) path.
    x3 = jax.random.normal(k3, (1, 37, 32), dtype=jnp.float32)
    w3 = jnp.ones((32,), jnp.float32)
    out3 = jax.block_until_ready(biasfree_layernorm(x3, w3))
    assert out3.shape == x3.shape
    assert jnp.allclose(out3, reference_biasfree_layernorm(x3, w3), atol=2e-5, rtol=2e-5), \
        "row-pad path mismatch vs reference"

    # bf16 I/O (16-sublane alignment path); statistics still f32 inside the kernel.
    x4 = jax.random.normal(k4, (2, 64, 32), dtype=jnp.float32).astype(jnp.bfloat16)
    w4 = jnp.ones((32,), jnp.float32)
    out4 = jax.block_until_ready(biasfree_layernorm(x4, w4))
    assert out4.dtype == jnp.bfloat16
    assert jnp.allclose(out4.astype(jnp.float32),
                        reference_biasfree_layernorm(x4, w4), atol=5e-2, rtol=5e-2), \
        "bf16 path mismatch vs reference"

    # C not worth packing (plain lane-padded path), e.g. C = 100.
    x5 = jax.random.normal(k5, (1, 24, 100), dtype=jnp.float32)
    w5 = jnp.ones((100,), jnp.float32)
    out5 = jax.block_until_ready(biasfree_layernorm(x5, w5))
    assert jnp.allclose(out5, reference_biasfree_layernorm(x5, w5), atol=2e-5, rtol=2e-5), \
        "plain path mismatch vs reference"

    print("KERNEL_OK")
</pallas_src>

<mosaic_0001>
module attributes {stable_mosaic.version = 11 : i64} {
  func.func @_ln_packed_kernel(%arg0: i32, %arg1: memref<32x128xf32, #tpu.memory_space<vmem>>, %arg2: memref<1x128xf32, #tpu.memory_space<vmem>>, %arg3: memref<128x128xf32, #tpu.memory_space<vmem>>, %arg4: memref<128x128xf32, #tpu.memory_space<vmem>>, %arg5: memref<32x128xf32, #tpu.memory_space<vmem>>) attributes {dimension_semantics = [#tpu.dimension_semantics<parallel>], iteration_bounds = array<i64: 1>, scalar_prefetch = 0 : i64, scratch_operands = 0 : i64, tpu.core_type = #tpu.core_type<tc>, window_params = [{transform_indices = @transform_0, window_bounds = array<i64: 32, 128>}, {pipeline_mode = #tpu.pipeline_mode<synchronous>, transform_indices = @transform_1, window_bounds = array<i64: 1, 128>}, {pipeline_mode = #tpu.pipeline_mode<synchronous>, transform_indices = @transform_2, window_bounds = array<i64: 128, 128>}, {pipeline_mode = #tpu.pipeline_mode<synchronous>, transform_indices = @transform_3, window_bounds = array<i64: 128, 128>}, {transform_indices = @transform_4, window_bounds = array<i64: 32, 128>}]} {
    %c0 = arith.constant 0 : index
    %c0_0 = arith.constant 0 : index
    %0 = vector.load %arg1[%c0, %c0_0] : memref<32x128xf32, #tpu.memory_space<vmem>>, vector<32x128xf32>
    %c0_1 = arith.constant 0 : index
    %c0_2 = arith.constant 0 : index
    %1 = vector.load %arg3[%c0_1, %c0_2] : memref<128x128xf32, #tpu.memory_space<vmem>>, vector<128x128xf32>
    %cst = arith.constant dense<0.000000e+00> : vector<32x128xf32>
    %2 = tpu.matmul %0, %1, %cst {dimension_numbers = #tpu.dot_dimension_numbers<[1], [0], [0], [1], [0, 0, 1, 1], [], []>} : vector<32x128xf32>, vector<128x128xf32>, vector<32x128xf32> -> vector<32x128xf32>
    %3 = arith.mulf %0, %0 : vector<32x128xf32>
    %c0_3 = arith.constant 0 : index
    %c0_4 = arith.constant 0 : index
    %4 = vector.load %arg3[%c0_3, %c0_4] : memref<128x128xf32, #tpu.memory_space<vmem>>, vector<128x128xf32>
    %cst_5 = arith.constant dense<0.000000e+00> : vector<32x128xf32>
    %5 = tpu.matmul %3, %4, %cst_5 {dimension_numbers = #tpu.dot_dimension_numbers<[1], [0], [0], [1], [0, 0, 1, 1], [], []>} : vector<32x128xf32>, vector<128x128xf32>, vector<32x128xf32> -> vector<32x128xf32>
    %cst_6 = arith.constant 3.125000e-02 : f32
    %6 = vector.broadcast %cst_6 : f32 to vector<32x128xf32>
    %7 = arith.mulf %2, %6 : vector<32x128xf32>
    %cst_7 = arith.constant 3.125000e-02 : f32
    %8 = vector.broadcast %cst_7 : f32 to vector<32x128xf32>
    %9 = arith.mulf %5, %8 : vector<32x128xf32>
    %10 = arith.mulf %7, %7 : vector<32x128xf32>
    %11 = arith.subf %9, %10 : vector<32x128xf32>
    %cst_8 = arith.constant 9.99999974E-6 : f32
    %12 = vector.broadcast %cst_8 : f32 to vector<32x128xf32>
    %13 = arith.addf %11, %12 : vector<32x128xf32>
    %14 = math.rsqrt %13 : vector<32x128xf32>
    %c0_9 = arith.constant 0 : index
    %c0_10 = arith.constant 0 : index
    %15 = vector.load %arg4[%c0_9, %c0_10] : memref<128x128xf32, #tpu.memory_space<vmem>>, vector<128x128xf32>
    %cst_11 = arith.constant dense<0.000000e+00> : vector<32x128xf32>
    %16 = tpu.matmul %14, %15, %cst_11 {dimension_numbers = #tpu.dot_dimension_numbers<[1], [0], [0], [1], [0, 0, 1, 1], [], []>} : vector<32x128xf32>, vector<128x128xf32>, vector<32x128xf32> -> vector<32x128xf32>
    %c0_12 = arith.constant 0 : index
    %c0_13 = arith.constant 0 : index
    %17 = vector.load %arg2[%c0_12, %c0_13] : memref<1x128xf32, #tpu.memory_space<vmem>>, vector<1x128xf32>
    %18 = arith.mulf %0, %16 : vector<32x128xf32>
    %19 = vector.broadcast %17 : vector<1x128xf32> to vector<32x128xf32>
    %20 = arith.mulf %18, %19 : vector<32x128xf32>
    %c0_14 = arith.constant 0 : index
    %c0_15 = arith.constant 0 : index
    %21 = vector.load %arg5[%c0_14, %c0_15] : memref<32x128xf32, #tpu.memory_space<vmem>>, vector<32x128xf32>
    tpu.vector_store %arg5[%c0_14, %c0_15], %20 {strides = array<i32>} : memref<32x128xf32, #tpu.memory_space<vmem>>, vector<32x128xf32>,
    return
  }
  func.func @transform_0(%arg0: i32) -> (i32, i32) {
    %c0_i32 = arith.constant 0 : i32
    %c0_i32_0 = arith.constant 0 : i32
    return %arg0, %c0_i32 : i32, i32
  }
  func.func @transform_1(%arg0: i32) -> (i32, i32) {
    %c0_i32 = arith.constant 0 : i32
    %c0_i32_0 = arith.constant 0 : i32
    %c0_i32_1 = arith.constant 0 : i32
    return %c0_i32, %c0_i32_0 : i32, i32
  }
  func.func @transform_2(%arg0: i32) -> (i32, i32) {
    %c0_i32 = arith.constant 0 : i32
    %c0_i32_0 = arith.constant 0 : i32
    %c0_i32_1 = arith.constant 0 : i32
    return %c0_i32, %c0_i32_0 : i32, i32
  }
  func.func @transform_3(%arg0: i32) -> (i32, i32) {
    %c0_i32 = arith.constant 0 : i32
    %c0_i32_0 = arith.constant 0 : i32
    %c0_i32_1 = arith.constant 0 : i32
    return %c0_i32, %c0_i32_0 : i32, i32
  }
  func.func @transform_4(%arg0: i32) -> (i32, i32) {
    %c0_i32 = arith.constant 0 : i32
    %c0_i32_0 = arith.constant 0 : i32
    return %arg0, %c0_i32 : i32, i32
  }
}

</mosaic_0001>

<bundles_post_ra>
// kernel: tpu_custom_call.1
= control target key start
LH: loop header
LB: loop body
LE: loop exit
PB: predicated region body
PF: predicated region fallthrough
CT: control target
= control target key end

     0   :  { %9 = vsyncpa [#allocation3], 0  ;;  %s804_s0 = inlined_call_operand.hbm [shape: f32[32,128], index: 0, kind: input, shape index: {}]   ;;  %s805_s1 = inlined_call_operand.vmem [shape: f32[1,128], index: 1, kind: input, shape index: {}]   ;;  %s806_s2 = inlined_call_operand.hbm [shape: f32[128,128], index: 2, kind: input, shape index: {}]   ;;  %s807_s3 = inlined_call_operand.hbm [shape: f32[128,128], index: 3, kind: input, shape index: {}]   ;;  %s808_s4 = inlined_call_operand.hbm [shape: f32[32,128], index: 4, kind: output, shape index: {}]  }
   0x1   :  { %10 = vsyncpa [#allocation6], 0 }
   0x2   :  { %11 = vsyncpa [#allocation4], 0  ;;  %s722_s15 = smov [#allocation5]   ;;  %s723_s17 = smov [#allocation2]  }
   0x3   :  { %s31_s16 = sshll.u32 %s722_s15, 4  ;;  %s17_s18 = sshll.u32 %s723_s17, 4  ;;  %s32_s16 = int_to_ptr.vmem [resolvable:$true] %s31_s16  ;;  %s18_s18 = int_to_ptr.vmem [resolvable:$true] %s17_s18 }
   0x4   :  { %s644_s19 = scalar_lea.vmem %s32_s16, 2048  ;;  %p649_p1 = scmp.lt.s32.totalorder %s32_s16, %s32_s16 }
   0x5   :  { %p645_p0 = scmp.ne.s32.totalorder %s32_s16, %s644_s19  ;;  %p650_p2 = scmp.lt.s32.totalorder %s644_s19, %s644_s19 }
   0x7   :  { %p651_p3 = por %p650_p2, %p649_p1 }
   0x9   :  { %p652_p4 = pnand %p651_p3, %p645_p0 }
   0xb   :  { %655 = shalt.err (!%p652_p4)
}
   0xc   :  { %s724_s20 = smov 128   ;;  %s725_s21 = smov 8  }
   0xd   :  { %37 = dma.hbm_to_vmem [thread:$0]  %s806_s2, 2048, %s32_s16, [#allocation6], %s724_s20, %s724_s20, %s725_s21  }
   0xe   :  { %s664_s24 = scalar_lea.vmem %s18_s18, 512  ;;  %p669_p6 = scmp.lt.s32.totalorder %s18_s18, %s18_s18 }
   0xf   :  { %p665_p5 = scmp.ne.s32.totalorder %s18_s18, %s664_s24  ;;  %p670_p7 = scmp.lt.s32.totalorder %s664_s24, %s664_s24 }
  0x11   :  { %p671_p8 = por %p670_p7, %p669_p6 }
  0x13   :  { %p672_p9 = pnand %p671_p8, %p665_p5 }
  0x15   :  { %675 = shalt.err (!%p672_p9)
}
  0x16   :  { %23 = dma.hbm_to_vmem [thread:$0]  %s804_s0, 512, %s18_s18, [#allocation3], %s724_s20, %s724_s20, %s725_s21  }
  0x17   :  { %s726_s27 = smov [#allocation7]  }
  0x18   :  { %s43_s28 = sshll.u32 %s726_s27, 4  ;;  %s44_s28 = int_to_ptr.vmem [resolvable:$true] %s43_s28 }
  0x19   :  { %s684_s29 = scalar_lea.vmem %s44_s28, 2048  ;;  %p689_p11 = scmp.lt.s32.totalorder %s44_s28, %s44_s28 }
  0x1a   :  { %p685_p10 = scmp.ne.s32.totalorder %s44_s28, %s684_s29  ;;  %p690_p12 = scmp.lt.s32.totalorder %s684_s29, %s684_s29 }
  0x1c   :  { %p691_p13 = por %p690_p12, %p689_p11 }
  0x1e   :  { %p692_p0 = pnand %p691_p13, %p685_p10 }
  0x20   :  { %695 = shalt.err (!%p692_p0)
}
  0x21   :  { %49 = dma.hbm_to_vmem [thread:$0]  %s807_s3, 2048, %s44_s28, [#allocation6], %s724_s20, %s724_s20, %s725_s21  }
  0x22   :  { %716 = dma.done.wait [#allocation3], 512  }
  0x23   :  { %717 = vsyncadd [#allocation3], 4294966784 }
  0x24   :  { %718 = dma.done.wait [#allocation6], 4096  }
  0x25   :  { %719 = vsyncadd [#allocation6], 4294963200  ;;  %v78_v0 = vld [vmem:[#allocation5 + $0x78] sm:$0xff]  ;;  %v77_v1 = vld [vmem:[#allocation5 + $0x70] sm:$0xff]  ;;  %s727_s5 = smov [#allocation8]  }
  0x26   :  { %476 = vmatprep.subr.mxu0 %v78_v0  ;;  %514 = vmatprep.subr.mxu1 %v78_v0  ;;  %v76_v2 = vld [vmem:[#allocation5 + $0x68] sm:$0xff]  ;;  %v75_v3 = vld [vmem:[#allocation5 + $0x60] sm:$0xff]  ;;  %v74_v4 = vld [vmem:[#allocation5 + $0x58] sm:$0xff]  ;;  %s402_s6 = sshll.u32 %s727_s5, 4  ;;  %s403_s6 = int_to_ptr.vmem [resolvable:$true] %s402_s6 }
  0x27   :  { %477 = vmatpush3.msra.mxu0 %v78_v0  ;;  %515 = vmatpush3.msra.mxu1 %v78_v0  ;;  %v73_v5 = vld [vmem:[#allocation5 + $0x50] sm:$0xff]  ;;  %v72_v6 = vld [vmem:[#allocation5 + $0x48] sm:$0xff]  ;;  %v71_v7 = vld [vmem:[#allocation5 + $0x40] sm:$0xff]  ;;  %p701_p2 = scmp.lt.s32.totalorder %s403_s6, %s403_s6 }
  0x28   :  { %478 = vmatprep.subr.mxu0 %v77_v1  ;;  %516 = vmatprep.subr.mxu1 %v77_v1  ;;  %v70_v8 = vld [vmem:[#allocation5 + $0x38] sm:$0xff]  ;;  %v69_v9 = vld [vmem:[#allocation5 + $0x30] sm:$0xff]  ;;  %v68_v10 = vld [vmem:[#allocation5 + $0x28] sm:$0xff] }
  0x29   :  { %479 = vmatpush3.msra.mxu0 %v77_v1  ;;  %517 = vmatpush3.msra.mxu1 %v77_v1  ;;  %v67_v11 = vld [vmem:[#allocation5 + $0x20] sm:$0xff]  ;;  %v66_v12 = vld [vmem:[#allocation5 + $0x18] sm:$0xff]  ;;  %v65_v13 = vld [vmem:[#allocation5 + $0x10] sm:$0xff] }
  0x2a   :  { %480 = vmatprep.subr.mxu0 %v76_v2  ;;  %518 = vmatprep.subr.mxu1 %v76_v2  ;;  %v64_v14 = vld [vmem:[#allocation5 + $0x8] sm:$0xff]  ;;  %v771_v15 = vld [vmem:[#allocation2] sm:$0xff]  ;;  %v775_v18 = vld [vmem:[#allocation2 + $0x10] sm:$0xff] }
  0x2b   :  { %481 = vmatpush3.msra.mxu0 %v76_v2  ;;  %519 = vmatpush3.msra.mxu1 %v76_v2  ;;  %v773_v16 = vld [vmem:[#allocation2 + $0x8] sm:$0xff]  ;;  %v63_v17 = vld [vmem:[#allocation5] sm:$0xff]  ;;  %v164_v19 = vmul.f32 %v771_v15, %v771_v15  ;;  %v166_v21 = vmul.f32 %v775_v18, %v775_v18  ;;  %v783_v22 = vld [vmem:[#allocation2 + $0x18] sm:$0xff] }
  0x2c   :  { %482 = vmatprep.subr.mxu0 %v75_v3  ;;  %520 = vmatprep.subr.mxu1 %v75_v3  ;;  %v165_v20 = vmul.f32 %v773_v16, %v773_v16  ;;  %v292_v23 = vld [vmem:[#allocation7 + $0x78] sm:$0xff]  ;;  %v167_v24 = vmul.f32 %v783_v22, %v783_v22  ;;  %v291_v25 = vld [vmem:[#allocation7 + $0x70] sm:$0xff]  ;;  %v290_v26 = vld [vmem:[#allocation7 + $0x68] sm:$0xff] }
  0x2d   :  { %483 = vmatpush3.msra.mxu0 %v75_v3  ;;  %521 = vmatpush3.msra.mxu1 %v75_v3  ;;  %v289_v27 = vld [vmem:[#allocation7 + $0x60] sm:$0xff]  ;;  %v288_v28 = vld [vmem:[#allocation7 + $0x58] sm:$0xff]  ;;  %v287_v29 = vld [vmem:[#allocation7 + $0x50] sm:$0xff] }
  0x2e   :  { %484 = vmatprep.subr.mxu0 %v74_v4  ;;  %522 = vmatprep.subr.mxu1 %v74_v4  ;;  %v286_v30 = vld [vmem:[#allocation7 + $0x48] sm:$0xff]  ;;  %v285_v31 = vld [vmem:[#allocation7 + $0x40] sm:$0xff]  ;;  %v284_v32 = vld [vmem:[#allocation7 + $0x38] sm:$0xff] }
  0x2f   :  { %485 = vmatpush3.msra.mxu0 %v74_v4  ;;  %523 = vmatpush3.msra.mxu1 %v74_v4  ;;  %v283_v33 = vld [vmem:[#allocation7 + $0x30] sm:$0xff]  ;;  %v282_v34 = vld [vmem:[#allocation7 + $0x28] sm:$0xff]  ;;  %v281_v35 = vld [vmem:[#allocation7 + $0x20] sm:$0xff] }
  0x30   :  { %486 = vmatprep.subr.mxu0 %v73_v5  ;;  %524 = vmatprep.subr.mxu1 %v73_v5  ;;  %v280_v36 = vld [vmem:[#allocation7 + $0x18] sm:$0xff]  ;;  %v279_v37 = vld [vmem:[#allocation7 + $0x10] sm:$0xff]  ;;  %v278_v38 = vld [vmem:[#allocation7 + $0x8] sm:$0xff] }
  0x31   :  { %487 = vmatpush3.msra.mxu0 %v73_v5  ;;  %525 = vmatpush3.msra.mxu1 %v73_v5  ;;  %v277_v39 = vld [vmem:[#allocation7] sm:$0xff] }
  0x32   :  { %488 = vmatprep.subr.mxu0 %v72_v6  ;;  %526 = vmatprep.subr.mxu1 %v72_v6 }
  0x33   :  { %489 = vmatpush3.msra.mxu0 %v72_v6  ;;  %527 = vmatpush3.msra.mxu1 %v72_v6 }
  0x34   :  { %490 = vmatprep.subr.mxu0 %v71_v7  ;;  %528 = vmatprep.subr.mxu1 %v71_v7 }
  0x35   :  { %491 = vmatpush3.msra.mxu0 %v71_v7  ;;  %529 = vmatpush3.msra.mxu1 %v71_v7 }
  0x36   :  { %492 = vmatprep.subr.mxu0 %v70_v8  ;;  %530 = vmatprep.subr.mxu1 %v70_v8 }
  0x37   :  { %493 = vmatpush3.msra.mxu0 %v70_v8  ;;  %531 = vmatpush3.msra.mxu1 %v70_v8 }
  0x38   :  { %494 = vmatprep.subr.mxu0 %v69_v9  ;;  %532 = vmatprep.subr.mxu1 %v69_v9 }
  0x39   :  { %495 = vmatpush3.msra.mxu0 %v69_v9  ;;  %533 = vmatpush3.msra.mxu1 %v69_v9  ;;  %v415_v9 = vld [vmem:[%s805_s1] ss:$0 sm:$0xff]  ;;  %s696_s1 = scalar_lea.vmem %s403_s6, 512 }
  0x3a   :  { %496 = vmatprep.subr.mxu0 %v68_v10  ;;  %534 = vmatprep.subr.mxu1 %v68_v10  ;;  %p697_p1 = scmp.ne.s32.totalorder %s403_s6, %s696_s1  ;;  %p702_p3 = scmp.lt.s32.totalorder %s696_s1, %s696_s1 }
  0x3b   :  { %497 = vmatpush3.msra.mxu0 %v68_v10  ;;  %535 = vmatpush3.msra.mxu1 %v68_v10 }
  0x3c   :  { %498 = vmatprep.subr.mxu0 %v67_v11  ;;  %536 = vmatprep.subr.mxu1 %v67_v11  ;;  %p703_p4 = por %p702_p3, %p701_p2 }
  0x3d   :  { %499 = vmatpush3.msra.mxu0 %v67_v11  ;;  %537 = vmatpush3.msra.mxu1 %v67_v11 }
  0x3e   :  { %500 = vmatprep.subr.mxu0 %v66_v12  ;;  %538 = vmatprep.subr.mxu1 %v66_v12  ;;  %p704_p5 = pnand %p703_p4, %p697_p1 }
  0x3f   :  { %501 = vmatpush3.msra.mxu0 %v66_v12  ;;  %539 = vmatpush3.msra.mxu1 %v66_v12 }
  0x40   :  { %502 = vmatprep.subr.mxu0 %v65_v13  ;;  %540 = vmatprep.subr.mxu1 %v65_v13 }
  0x41   :  { %503 = vmatpush3.msra.mxu0 %v65_v13  ;;  %541 = vmatpush3.msra.mxu1 %v65_v13 }
  0x42   :  { %504 = vmatprep.subr.mxu0 %v64_v14  ;;  %542 = vmatprep.subr.mxu1 %v64_v14 }
  0x43   :  { %505 = vmatpush3.msra.mxu0 %v64_v14  ;;  %543 = vmatpush3.msra.mxu1 %v64_v14 }
  0x44   :  { %506 = vmatprep.subr.mxu0 %v63_v17  ;;  %544 = vmatprep.subr.mxu1 %v63_v17 }
  0x45   :  { %507 = vmatpush3.msra.mxu0 %v63_v17  ;;  %508 = vmatprep.mubr.f32.mxu0 %v771_v15 }
  0x46   :  { %545 = vmatpush3.msra.mxu1 %v63_v17  ;;  %546 = vmatprep.mubr.f32.mxu1 %v164_v19 }
  0x47   :  { %509 = vmatmul.mubr.f32.vlgmr.msra.gmra.mxu0 %v773_v16  ;;  %547 = vmatmul.mubr.f32.vlgmr.msra.gmra.mxu1 %v165_v20 }
  0x48   :  { %511 = vmatprep.mubr.f32.mxu0 %v775_v18  ;;  %549 = vmatprep.mubr.f32.mxu1 %v166_v21 }
  0x49   :  { %552 = vmatprep.subr.mxu0 %v292_v23  ;;  %590 = vmatprep.subr.mxu1 %v292_v23 }
  0x4a   :  { %553 = vmatpush3.msra.mxu0 %v292_v23  ;;  %606 = vmatpush3.msra.mxu1 %v292_v23 }
  0x4b   :  { %512 = vmatmul.mubr.f32.gmra.mxu0 %v783_v22  ;;  %550 = vmatmul.mubr.f32.gmra.mxu1 %v167_v24 }
  0x4c   :  { %554 = vmatprep.subr.mxu0 %v291_v25  ;;  %591 = vmatprep.subr.mxu1 %v291_v25 }
  0x4d   :  { %555 = vmatpush3.msra.mxu0 %v291_v25  ;;  %607 = vmatpush3.msra.mxu1 %v291_v25 }
  0x4e   :  { %556 = vmatprep.subr.mxu0 %v290_v26  ;;  %592 = vmatprep.subr.mxu1 %v290_v26 }
  0x4f   :  { %557 = vmatpush3.msra.mxu0 %v290_v26  ;;  %608 = vmatpush3.msra.mxu1 %v290_v26 }
  0x50   :  { %558 = vmatprep.subr.mxu0 %v289_v27  ;;  %593 = vmatprep.subr.mxu1 %v289_v27 }
  0x51   :  { %559 = vmatpush3.msra.mxu0 %v289_v27  ;;  %609 = vmatpush3.msra.mxu1 %v289_v27 }
  0x52   :  { %560 = vmatprep.subr.mxu0 %v288_v28  ;;  %594 = vmatprep.subr.mxu1 %v288_v28 }
  0x53   :  { %561 = vmatpush3.msra.mxu0 %v288_v28  ;;  %610 = vmatpush3.msra.mxu1 %v288_v28 }
  0x54   :  { %562 = vmatprep.subr.mxu0 %v287_v29  ;;  %595 = vmatprep.subr.mxu1 %v287_v29 }
  0x55   :  { %563 = vmatpush3.msra.mxu0 %v287_v29  ;;  %611 = vmatpush3.msra.mxu1 %v287_v29 }
  0x56   :  { %564 = vmatprep.subr.mxu0 %v286_v30  ;;  %596 = vmatprep.subr.mxu1 %v286_v30 }
  0x57   :  { %565 = vmatpush3.msra.mxu0 %v286_v30  ;;  %612 = vmatpush3.msra.mxu1 %v286_v30 }
  0x58   :  { %566 = vmatprep.subr.mxu0 %v285_v31  ;;  %597 = vmatprep.subr.mxu1 %v285_v31 }
  0x59   :  { %567 = vmatpush3.msra.mxu0 %v285_v31  ;;  %613 = vmatpush3.msra.mxu1 %v285_v31 }
  0x5a   :  { %568 = vmatprep.subr.mxu0 %v284_v32  ;;  %598 = vmatprep.subr.mxu1 %v284_v32 }
  0x5b   :  { %569 = vmatpush3.msra.mxu0 %v284_v32  ;;  %614 = vmatpush3.msra.mxu1 %v284_v32 }
  0x5c   :  { %570 = vmatprep.subr.mxu0 %v283_v33  ;;  %599 = vmatprep.subr.mxu1 %v283_v33 }
  0x5d   :  { %571 = vmatpush3.msra.mxu0 %v283_v33  ;;  %615 = vmatpush3.msra.mxu1 %v283_v33 }
  0x5e   :  { %572 = vmatprep.subr.mxu0 %v282_v34  ;;  %600 = vmatprep.subr.mxu1 %v282_v34 }
  0x5f   :  { %573 = vmatpush3.msra.mxu0 %v282_v34  ;;  %616 = vmatpush3.msra.mxu1 %v282_v34 }
  0x60   :  { %574 = vmatprep.subr.mxu0 %v281_v35  ;;  %601 = vmatprep.subr.mxu1 %v281_v35 }
  0x61   :  { %575 = vmatpush3.msra.mxu0 %v281_v35  ;;  %617 = vmatpush3.msra.mxu1 %v281_v35 }
  0x62   :  { %576 = vmatprep.subr.mxu0 %v280_v36  ;;  %602 = vmatprep.subr.mxu1 %v280_v36 }
  0x63   :  { %577 = vmatpush3.msra.mxu0 %v280_v36  ;;  %618 = vmatpush3.msra.mxu1 %v280_v36 }
  0x64   :  { %578 = vmatprep.subr.mxu0 %v279_v37  ;;  %603 = vmatprep.subr.mxu1 %v279_v37 }
  0x65   :  { %579 = vmatpush3.msra.mxu0 %v279_v37  ;;  %619 = vmatpush3.msra.mxu1 %v279_v37 }
  0x66   :  { %580 = vmatprep.subr.mxu0 %v278_v38  ;;  %604 = vmatprep.subr.mxu1 %v278_v38 }
  0x67   :  { %581 = vmatpush3.msra.mxu0 %v278_v38  ;;  %620 = vmatpush3.msra.mxu1 %v278_v38 }
  0x68   :  { %582 = vmatprep.subr.mxu0 %v277_v39  ;;  %605 = vmatprep.subr.mxu1 %v277_v39 }
  0x69   :  { %583 = vmatpush3.msra.mxu0 %v277_v39  ;;  %621 = vmatpush3.msra.mxu1 %v277_v39 }
 0x107   :  { %v510_v40 = vpop.f32.mrf.mxu0  ;;  %v548_v41 = vpop.f32.mrf.mxu1 }
 0x108   :  { %v254_v42 = vmul.f32 0.03125, %v510_v40  ;;  %v258_v43 = vmul.f32 0.03125, %v548_v41 }
 0x109   :  { %v145_v44 = vpop.f32.mrf.mxu0  ;;  %v234_v45 = vpop.f32.mrf.mxu1 }
 0x10a   :  { %v262_v46 = vmul.f32 %v254_v42, %v254_v42  ;;  %v253_v47 = vmul.f32 0.03125, %v145_v44  ;;  %v257_v48 = vmul.f32 0.03125, %v234_v45 }
 0x10b   :  { %v513_v49 = vpop.f32.mrf.mxu0  ;;  %v551_v50 = vpop.f32.mrf.mxu1 }
 0x10c   :  { %v266_v51 = vsub.f32 %v258_v43, %v262_v46  ;;  %v261_v52 = vmul.f32 %v253_v47, %v253_v47  ;;  %v256_v53 = vmul.f32 0.03125, %v513_v49  ;;  %v260_v54 = vmul.f32 0.03125, %v551_v50 }
 0x10d   :  { %v155_v55 = vpop.f32.mrf.mxu0  ;;  %v244_v56 = vpop.f32.mrf.mxu1 }
 0x10e   :  { %v265_v57 = vsub.f32 %v257_v48, %v261_v52  ;;  %v264_v58 = vmul.f32 %v256_v53, %v256_v53  ;;  %v255_v59 = vmul.f32 0.03125, %v155_v55  ;;  %v270_v60 = vadd.f32 1e-05, %v266_v51 }
 0x10f   :  { %v259_v0 = vmul.f32 0.03125, %v244_v56 }
 0x110   :  { %v269_v61 = vadd.f32 1e-05, %v265_v57  ;;  %v268_v62 = vsub.f32 %v260_v54, %v264_v58  ;;  %v263_v63 = vmul.f32 %v255_v59, %v255_v59 }
 0x112   :  { %628 = vrsqrt.f32 %v269_v61  ;;  %v267_v1 = vsub.f32 %v259_v0, %v263_v63  ;;  %v272_v2 = vadd.f32 1e-05, %v268_v62 }
 0x113   :  { %630 = vrsqrt.f32 %v270_v60 }
 0x114   :  { %v271_v3 = vadd.f32 1e-05, %v267_v1 }
 0x116   :  { %632 = vrsqrt.f32 %v271_v3 }
 0x117   :  { %634 = vrsqrt.f32 %v272_v2 }
 0x11f   :  { %v629_v4 = vpop.eup %628 }
 0x120   :  { %v631_v5 = vpop.eup %630  ;;  %584 = vmatprep.mubr.f32.mxu0 %v629_v4 }
 0x121   :  { %585 = vmatmul.mubr.f32.vlgmr.msra.gmra.mxu0 %v631_v5 }
 0x123   :  { %v633_v6 = vpop.eup %632 }
 0x124   :  { %v635_v7 = vpop.eup %634  ;;  %587 = vmatprep.mubr.f32.mxu1 %v633_v6 }
 0x125   :  { %588 = vmatmul.mubr.f32.vlgmr.msra.gmra.mxu1 %v635_v7 }
 0x1e1   :  { %v586_v8 = vpop.f32.mrf.mxu0 }
 0x1e2   :  { %v380_v10 = vmul.f32 %v586_v8, %v773_v16 }
 0x1e3   :  { %v359_v11 = vpop.f32.mrf.mxu0 }
 0x1e4   :  { %v390_v12 = vmul.f32 %v415_v9, %v380_v10  ;;  %v379_v13 = vmul.f32 %v359_v11, %v771_v15 }
 0x1e5   :  { %v589_v14 = vpop.f32.mrf.mxu1 }
 0x1e6   :  { %394 = vst [vmem:[#allocation8 + $0x8] sm:$0xff] %v390_v12  ;;  %v389_v17 = vmul.f32 %v415_v9, %v379_v13  ;;  %v382_v19 = vmul.f32 %v589_v14, %v783_v22 }
 0x1e7   :  { %v369_v20 = vpop.f32.mrf.mxu1 }
 0x1e8   :  { %393 = vst [vmem:[#allocation8] sm:$0xff] %v389_v17  ;;  %v392_v21 = vmul.f32 %v415_v9, %v382_v19  ;;  %v381_v23 = vmul.f32 %v369_v20, %v775_v18 }
 0x1ea   :  { %396 = vst [vmem:[#allocation8 + $0x18] sm:$0xff] %v392_v21  ;;  %v391_v24 = vmul.f32 %v415_v9, %v381_v23 }
 0x1ec   :  { %395 = vst [vmem:[#allocation8 + $0x10] sm:$0xff] %v391_v24 }
 0x1ed   :  { %707 = shalt.err (!%p704_p5)
}
 0x1ee   :  { %408 = dma.vmem_to_hbm [thread:$0]  %s403_s6, 512, %s808_s4, [#allocation4], %s724_s20, %s724_s20, %s725_s21  }
 0x1ef   :  { %720 = dma.done.wait [#allocation4], 512  }
 0x1f0   :  { %721 = vsyncadd [#allocation4], 4294966784 }
 0x1f1   :  { %412 = vsyncpa [#allocation3], 1 }
 0x1f2   :  { %413 = vsyncpa [#allocation6], 1 }
 0x1f3   :  { %414 = vsyncpa [#allocation4], 1 }

</bundles_post_ra>
